<compile_context>
chip_gen: v7x
topology: tpu7x:2x2x1
jax: 0.10.0
libtpu: 0.0.40
codegen_flags: <defaults>
</compile_context>

<pallas_src>
import functools

import jax
import jax.numpy as jnp
import numpy as np
from jax import lax
from jax.experimental import pallas as pl
from jax.experimental.pallas import tpu as pltpu

LANES = 128
_PAD_BIG = 1e4          # exp(-1e4) == 0.0 exactly in f32 -> masked loss is exactly 0
_STRIP = 256            # rows per in-kernel compute strip (multiple of 8)


def _pow_static(u, gamma):
    """u ** gamma with compile-time specialization for small integer gamma."""
    g = float(gamma)
    if g == 0.0:
        return jnp.ones_like(u)
    if g > 0.0 and g.is_integer() and g <= 16.0:
        n = int(g)
        result = None
        base = u
        while n:
            if n & 1:
                result = base if result is None else result * base
            n >>= 1
            if n:
                base = base * base
        return result
    return jnp.power(u, g)


def _focal_kernel(x_ref, t_ref, out_ref, *, alpha0, alpha1, gamma,
                  rows_total, strip, need_mask):
    # x_ref: (2, tile_h, Wl) logits, t_ref: (tile_h, Wl) int, out_ref: (acc_rows, Wl) f32
    tile_h = x_ref.shape[1]
    wl = x_ref.shape[2]
    n_strips = tile_h // strip
    acc_rows = 8 if strip % 8 == 0 else strip

    if need_mask:
        # Hoisted (not re-broadcast per strip): row index within a strip.
        row_iota = lax.broadcasted_iota(jnp.int32, (strip, wl), 0)
        rows_left = rows_total - pl.program_id(1) * tile_h

    def body(s, acc):
        off = s * strip
        if not isinstance(off, int):
            off = pl.multiple_of(off, strip)
        x0 = x_ref[0, pl.ds(off, strip), :].astype(jnp.float32)
        x1 = x_ref[1, pl.ds(off, strip), :].astype(jnp.float32)
        t = t_ref[pl.ds(off, strip), :]
        sel0 = t == 0

        # Binary log-softmax gather: log_softmax(x)[target] = -softplus(z),
        # z = x_other - x_target.
        d = x1 - x0
        z = jnp.where(sel0, d, -d)
        if need_mask:
            # Rows past the end of this (partial) tile contribute exactly 0.
            z = jnp.where(row_iota + off < rows_left, z, -_PAD_BIG)

        e = jnp.exp(-jnp.abs(z))                            # EUP heavy #1
        logpt = -(jnp.maximum(z, 0.0) + jnp.log(1.0 + e))   # EUP heavy #2
        # pt == exp(logpt) rewritten with the already-computed e (one divide
        # instead of a second full exp).
        pt = jnp.where(z >= 0.0, e, 1.0) / (1.0 + e)

        at = jnp.where(sel0, alpha0, alpha1)
        focal = _pow_static(jnp.maximum(1.0 - pt, 0.0), gamma)  # VPU for int gamma
        loss = -focal * (at * logpt)

        if acc_rows == 8:
            # Fold sublane groups with elementwise VPU adds (no XLU reduce).
            loss = loss.reshape(strip // 8, 8, wl).sum(axis=0)
        return acc + loss

    acc0 = jnp.zeros((acc_rows, wl), jnp.float32)
    if n_strips == 1:
        acc = body(0, acc0)
    else:
        acc = lax.fori_loop(0, n_strips, body, acc0)
    out_ref[...] = acc


def focal_loss(logits, target, alpha=0.25, gamma=4.0, *, step_bytes=8 << 20):
    """Pallas focal loss.  logits: (N, 2, H, W) float, target: (N, H, W) int."""
    N, C, H, W = logits.shape
    assert C == 2, "FocalLoss kernel requires exactly two classes"
    HW = H * W
    M = N * HW

    if isinstance(alpha, (list, tuple)):
        alpha0, alpha1 = float(alpha[0]), float(alpha[1])
    else:
        alpha0, alpha1 = float(alpha), float(1.0 - alpha)

    # Zero-copy views (contiguous reshapes only): lane-dense (rows, 128) when
    # possible, else the native (H, W) plane (W maps to lanes).
    if HW % LANES == 0:
        Hr, Wl = HW // LANES, LANES
    else:
        Hr, Wl = H, W
    x = logits.reshape(N, 2, Hr, Wl)
    t = target.reshape(N, Hr, Wl).astype(jnp.int32)

    # Row tiling: big HBM-streaming grid steps; _STRIP-row strips inside.
    lane_pad = -(-Wl // LANES) * LANES
    bytes_per_elem = 2 * logits.dtype.itemsize + 4
    if Hr <= _STRIP:
        tile_h, strip = Hr, Hr
    else:
        budget_rows = max(
            _STRIP,
            (int(step_bytes) // (lane_pad * bytes_per_elem)) // _STRIP * _STRIP)
        tile_h = max(_STRIP, min(budget_rows, (Hr // _STRIP) * _STRIP))
        # Make sure there are >= 2 grid steps so both v7x TensorCores get work.
        if N * (-(-Hr // tile_h)) < 2 and tile_h > _STRIP:
            tile_h = max(_STRIP, (Hr // 2) // _STRIP * _STRIP)
        strip = _STRIP
    num_h_tiles = -(-Hr // tile_h)
    need_mask = (Hr % tile_h) != 0
    acc_rows = 8 if strip % 8 == 0 else strip

    kernel = functools.partial(
        _focal_kernel, alpha0=alpha0, alpha1=alpha1, gamma=float(gamma),
        rows_total=Hr, strip=strip, need_mask=need_mask)

    in_specs = [
        pl.BlockSpec((None, 2, tile_h, Wl), lambda n, j: (n, 0, j, 0)),
        pl.BlockSpec((None, tile_h, Wl), lambda n, j: (n, j, 0)),
    ]
    out_specs = pl.BlockSpec((None, acc_rows, Wl),
                             lambda n, j: (n * num_h_tiles + j, 0, 0))

    # Explicit VMEM budget for the double-buffered per-step working set.
    block_vmem = tile_h * lane_pad * bytes_per_elem
    vmem_limit = int(min(max(3 * block_vmem + (4 << 20), 32 << 20), 64 << 20))

    cost = pl.CostEstimate(
        flops=int(18 * M),
        transcendentals=int(3 * M),
        bytes_accessed=int(M * bytes_per_elem
                           + N * num_h_tiles * acc_rows * Wl * 4))

    partials = pl.pallas_call(
        kernel,
        out_shape=jax.ShapeDtypeStruct((N * num_h_tiles, acc_rows, Wl),
                                       jnp.float32),
        grid_spec=pltpu.PrefetchScalarGridSpec(
            num_scalar_prefetch=0,
            grid=(N, num_h_tiles),
            in_specs=in_specs,
            out_specs=out_specs),
        compiler_params=pltpu.CompilerParams(
            dimension_semantics=("parallel", "parallel"),
            vmem_limit_bytes=vmem_limit),
        cost_estimate=cost,
    )(x, t)

    # Tiny final reduction + mean in the wrapper.
    return jnp.sum(partials) / jnp.float32(M)


def focal_loss_ref(logits, target, alpha=0.25, gamma=4.0):
    """Pure-JAX reference matching the PyTorch module."""
    N, C, H, W = logits.shape
    x = jnp.transpose(logits, (0, 2, 3, 1)).reshape(-1, C)   # (b h w) c
    t = target.reshape(-1)
    logp = jax.nn.log_softmax(x, axis=1)
    logpt = jnp.take_along_axis(logp, t[:, None], axis=1)[:, 0]
    pt = jnp.exp(logpt)
    if isinstance(alpha, (list, tuple)):
        alpha_vec = jnp.array(list(alpha), jnp.float32)
    else:
        alpha_vec = jnp.array([alpha, 1.0 - alpha], jnp.float32)
    at = alpha_vec[t]
    logpt = logpt * at
    loss = -1.0 * (1.0 - pt) ** gamma * logpt
    return jnp.mean(loss)


def _check(key, N, H, W):
    k1, k2 = jax.random.split(key)
    logits = jax.random.normal(k1, (N, 2, H, W), dtype=jnp.float32)
    target = jax.random.randint(k2, (N, H, W), 0, 2, dtype=jnp.int32)
    out = jax.block_until_ready(focal_loss(logits, target))
    ref = jax.block_until_ready(focal_loss_ref(logits, target))
    np.testing.assert_allclose(np.asarray(out), np.asarray(ref),
                               rtol=2e-4, atol=1e-6)


if __name__ == "__main__":
    key = jax.random.PRNGKey(0)
    k1, k2, k3 = jax.random.split(key, 3)
    # Small module-consistent shape (lane-dense single-tile path).
    _check(k1, N=2, H=16, W=16)
    # Multi-tile path with strip loop + ragged row-tail mask.
    _check(k2, N=1, H=520, W=128)
    # Non-multiple-of-128 spatial size (native (H, W) lane layout path).
    _check(k3, N=1, H=24, W=20)
    print("KERNEL_OK")
</pallas_src>

<mosaic_0001>
module attributes {stable_mosaic.version = 11 : i64} {
  func.func @_focal_kernel(%arg0: i32, %arg1: i32, %arg2: memref<1x2x2x128xf32, #tpu.memory_space<vmem>>, %arg3: memref<1x2x128xi32, #tpu.memory_space<vmem>>, %arg4: memref<1x2x128xf32, #tpu.memory_space<vmem>>) attributes {dimension_semantics = [#tpu.dimension_semantics<parallel>, #tpu.dimension_semantics<parallel>], iteration_bounds = array<i64: 2, 1>, scalar_prefetch = 0 : i64, scratch_operands = 0 : i64, tpu.core_type = #tpu.core_type<tc>, window_params = [{transform_indices = @transform_0, window_bounds = array<i64: 1, 2, 2, 128>}, {transform_indices = @transform_1, window_bounds = array<i64: 1, 2, 128>}, {transform_indices = @transform_2, window_bounds = array<i64: 1, 2, 128>}]} {
    %cst = arith.constant 0.000000e+00 : f32
    %0 = vector.broadcast %cst : f32 to vector<2x128xf32>
    %c0 = arith.constant 0 : index
    %c0_0 = arith.constant 0 : index
    %c0_1 = arith.constant 0 : index
    %c0_2 = arith.constant 0 : index
    %1 = vector.load %arg2[%c0, %c0_0, %c0_1, %c0_2] : memref<1x2x2x128xf32, #tpu.memory_space<vmem>>, vector<1x1x2x128xf32>
    %2 = vector.shape_cast %1 : vector<1x1x2x128xf32> to vector<2x128xf32>
    %c0_3 = arith.constant 0 : index
    %c1 = arith.constant 1 : index
    %c0_4 = arith.constant 0 : index
    %c0_5 = arith.constant 0 : index
    %3 = vector.load %arg2[%c0_3, %c1, %c0_4, %c0_5] : memref<1x2x2x128xf32, #tpu.memory_space<vmem>>, vector<1x1x2x128xf32>
    %4 = vector.shape_cast %3 : vector<1x1x2x128xf32> to vector<2x128xf32>
    %c0_6 = arith.constant 0 : index
    %c0_7 = arith.constant 0 : index
    %c0_8 = arith.constant 0 : index
    %5 = vector.load %arg3[%c0_6, %c0_7, %c0_8] : memref<1x2x128xi32, #tpu.memory_space<vmem>>, vector<1x2x128xi32>
    %6 = vector.shape_cast %5 : vector<1x2x128xi32> to vector<2x128xi32>
    %c0_i32 = arith.constant 0 : i32
    %7 = vector.broadcast %c0_i32 : i32 to vector<2x128xi32>
    %8 = arith.cmpi eq, %6, %7 : vector<2x128xi32>
    %9 = arith.subf %4, %2 : vector<2x128xf32>
    %cst_9 = arith.constant 0.000000e+00 : f32
    %10 = vector.broadcast %cst_9 : f32 to vector<2x128xf32>
    %11 = arith.subf %10, %9 : vector<2x128xf32>
    %12 = arith.select %8, %9, %11 : vector<2x128xi1>, vector<2x128xf32>
    %13 = math.absf %12 : vector<2x128xf32>
    %cst_10 = arith.constant 0.000000e+00 : f32
    %14 = vector.broadcast %cst_10 : f32 to vector<2x128xf32>
    %15 = arith.subf %14, %13 : vector<2x128xf32>
    %16 = math.exp %15 : vector<2x128xf32>
    %cst_11 = arith.constant 0.000000e+00 : f32
    %17 = vector.broadcast %cst_11 : f32 to vector<2x128xf32>
    %18 = arith.maximumf %12, %17 : vector<2x128xf32>
    %cst_12 = arith.constant 1.000000e+00 : f32
    %19 = vector.broadcast %cst_12 : f32 to vector<2x128xf32>
    %20 = arith.addf %19, %16 : vector<2x128xf32>
    %21 = math.log %20 : vector<2x128xf32>
    %22 = arith.addf %18, %21 : vector<2x128xf32>
    %cst_13 = arith.constant 0.000000e+00 : f32
    %23 = vector.broadcast %cst_13 : f32 to vector<2x128xf32>
    %24 = arith.subf %23, %22 : vector<2x128xf32>
    %cst_14 = arith.constant 0.000000e+00 : f32
    %25 = vector.broadcast %cst_14 : f32 to vector<2x128xf32>
    %26 = arith.cmpf oge, %12, %25 : vector<2x128xf32>
    %cst_15 = arith.constant 1.000000e+00 : f32
    %27 = vector.broadcast %cst_15 : f32 to vector<2x128xf32>
    %28 = arith.select %26, %16, %27 : vector<2x128xi1>, vector<2x128xf32>
    %cst_16 = arith.constant 1.000000e+00 : f32
    %29 = vector.broadcast %cst_16 : f32 to vector<2x128xf32>
    %30 = arith.addf %29, %16 : vector<2x128xf32>
    %31 = arith.divf %28, %30 : vector<2x128xf32>
    %cst_17 = arith.constant 2.500000e-01 : f32
    %cst_18 = arith.constant 7.500000e-01 : f32
    %32 = vector.broadcast %cst_17 : f32 to vector<2x128xf32>
    %33 = vector.broadcast %cst_18 : f32 to vector<2x128xf32>
    %34 = arith.select %8, %32, %33 : vector<2x128xi1>, vector<2x128xf32>
    %cst_19 = arith.constant 1.000000e+00 : f32
    %35 = vector.broadcast %cst_19 : f32 to vector<2x128xf32>
    %36 = arith.subf %35, %31 : vector<2x128xf32>
    %cst_20 = arith.constant 0.000000e+00 : f32
    %37 = vector.broadcast %cst_20 : f32 to vector<2x128xf32>
    %38 = arith.maximumf %36, %37 : vector<2x128xf32>
    %39 = arith.mulf %38, %38 : vector<2x128xf32>
    %40 = arith.mulf %39, %39 : vector<2x128xf32>
    %cst_21 = arith.constant 0.000000e+00 : f32
    %41 = vector.broadcast %cst_21 : f32 to vector<2x128xf32>
    %42 = arith.subf %41, %40 : vector<2x128xf32>
    %43 = arith.mulf %34, %24 : vector<2x128xf32>
    %44 = arith.mulf %42, %43 : vector<2x128xf32>
    %45 = arith.addf %0, %44 : vector<2x128xf32>
    %c0_22 = arith.constant 0 : index
    %c0_23 = arith.constant 0 : index
    %c0_24 = arith.constant 0 : index
    %46 = vector.load %arg4[%c0_22, %c0_23, %c0_24] : memref<1x2x128xf32, #tpu.memory_space<vmem>>, vector<1x2x128xf32>
    %47 = vector.shape_cast %46 : vector<1x2x128xf32> to vector<2x128xf32>
    %48 = vector.shape_cast %45 : vector<2x128xf32> to vector<1x2x128xf32>
    tpu.vector_store %arg4[%c0_22, %c0_23, %c0_24], %48 {strides = array<i32>} : memref<1x2x128xf32, #tpu.memory_space<vmem>>, vector<1x2x128xf32>,
    return
  }
  func.func @transform_0(%arg0: i32, %arg1: i32) -> (i32, i32, i32, i32) {
    %c0_i32 = arith.constant 0 : i32
    %c0_i32_0 = arith.constant 0 : i32
    %c0_i32_1 = arith.constant 0 : i32
    return %arg0, %c0_i32, %arg1, %c0_i32_0 : i32, i32, i32, i32
  }
  func.func @transform_1(%arg0: i32, %arg1: i32) -> (i32, i32, i32) {
    %c0_i32 = arith.constant 0 : i32
    %c0_i32_0 = arith.constant 0 : i32
    return %arg0, %arg1, %c0_i32 : i32, i32, i32
  }
  func.func @transform_2(%arg0: i32, %arg1: i32) -> (i32, i32, i32) {
    %c1_i32 = arith.constant 1 : i32
    %0 = arith.muli %arg0, %c1_i32 : i32
    %1 = arith.addi %0, %arg1 : i32
    %c0_i32 = arith.constant 0 : i32
    %c0_i32_0 = arith.constant 0 : i32
    %c0_i32_1 = arith.constant 0 : i32
    return %1, %c0_i32, %c0_i32_0 : i32, i32, i32
  }
}

</mosaic_0001>

<bundles_post_ra>
// kernel: tpu_custom_call.1
= control target key start
LH: loop header
LB: loop body
LE: loop exit
PB: predicated region body
PF: predicated region fallthrough
CT: control target
= control target key end

     0   :  { %7 = vsyncpa [#allocation3], 0  ;;  %s857_s0 = inlined_call_operand.hbm [shape: f32[2,2,2,128], index: 0, kind: input, shape index: {}]   ;;  %s858_s1 = inlined_call_operand.hbm [shape: s32[2,2,128], index: 1, kind: input, shape index: {}]   ;;  %s859_s2 = inlined_call_operand.hbm [shape: f32[2,2,128], index: 2, kind: output, shape index: {}]  }
   0x1   :  { %9 = vsyncpa [#allocation3 + $0x1], 0 }
   0x2   :  { %10 = vsyncpa [#allocation6], 0 }
   0x3   :  { %12 = vsyncpa [#allocation6 + $0x1], 0 }
   0x4   :  { %13 = vsyncpa [#allocation4], 0 }
   0x5   :  { %15 = vsyncpa [#allocation4 + $0x1], 0  ;;  %s636_s9 = smov 0   ;;  %s638_s10 = smov 0  }
   0x6   :  { %s640_s11 = smov 0   ;;  %s642_s12 = smov 0  }
   0x7   :  { %s644_s13 = smov 0   ;;  %s646_s14 = smov 0  }
   0x8 LB: > { %s372_s15 = sadd.s32 4294967295, %s613_s14   ;;  %s373_s16 = sadd.s32 4294967294, %s613_s14   ;;  %s613_s14 = sphi %s646_s14, %s21_s14   ;;  %s609_s13 = sphi %s644_s13, %s878_s13   ;;  %s605_s12 = sphi %s642_s12, %s877_s12   ;;  %s601_s11 = sphi %s640_s11, %s876_s11   ;;  %s597_s10 = sphi %s638_s10, %s875_s10   ;;  %s593_s9 = sphi %s636_s9, %s874_s9  }
   0x9   : > { %s33_s17 = sadd.s32 1, %s609_s13  ;;  %s42_s18 = sadd.s32 1, %s601_s11 }
   0xa   : > { %p35_p0 = scmp.ge.s32.totalorder %s33_s17, 2  ;;  %p49_p1 = scmp.ne.s32.totalorder %s601_s11, %s597_s10 }
   0xb   : > { %p50_p2 = scmp.eq.s32.totalorder %s613_s14, 0  ;;  %p55_p3 = scmp.ne.s32.totalorder %s597_s10, %s593_s9 }
   0xc   : > { %s880_s17 = smov (%p35_p0, %s33_s17), 0  ;;  %p56_p5 = scmp.eq.s32.totalorder %s372_s15, 0 }
   0xd   : > { %p677_p4 = por %p50_p2, %p49_p1  ;;  %s37_s20 = ssub.s32 %s609_s13, %s880_s17 }
   0xe   : > { %p109_p6 = scmp.eq.s32.totalorder %s372_s15, 1  ;;  %p40_p7 = scmp.eq.s32.totalorder %s37_s20, 0 }
   0xf   : > { %p683_p8 = por %p56_p5, %p55_p3  ;;  %p115_p10 = scmp.eq.s32.totalorder %s373_s16, 1 }
  0x10   : > { %p687_p9 = por %p109_p6, %p49_p1  ;;  %p408_p13 = scmp.lt.s32.totalorder %s613_s14, 2 }
  0x11   : > { %s863_s21 = scalar_select %p683_p8, 1, 0 }
  0x12   : > { %s864_s22 = scalar_select %p687_p9, 1, 0 }
  0x13   : > { %s692_s23 = scalar_select %p40_p7, %s601_s11, %s42_s18  }
  0x14   : > { %p694_p11 = por %p115_p10, %p55_p3  ;;  %s701_s25 = sand.u32 1, %s601_s11  }
  0x15   : > { %s376_s26 = sshll.u32 %s701_s25, 2  ;;  %s390_s27 = sshll.u32 %s609_s13, 6 }
  0x16   : > { %s865_s24 = scalar_select %p694_p11, 1, 0 }
  0x17   : > { %s708_s30 = scalar_lea.hbm %s857_s0, %s390_s27  ;;  %s139_s3 = scalar_lea.vmem [#allocation2], %s376_s26 }
  0x18   : > { %s147_s4 = sshll.u32 %s139_s3, 4  ;;  %p714_p0 = pnand %p408_p13, %p677_p4  ;;  %s710_s4 = int_to_ptr.vmem [resolvable:$true] %s147_s4 }
  0x19   : > { %s136_s6 = scalar_lea.sflag [#allocation3], %s701_s25  ;;  %s467_s7 = scalar_lea.hbm %s708_s30, 64 }
  0x1a   : > { %p468_p2 = scmp.ne.s32.totalorder %s708_s30, %s467_s7  ;;  %p469_p3 = pneg %p714_p0 }
  0x1b   : > { %s472_s16 = scalar_lea.hbm %s857_s0, 128  ;;  %p473_p4 = scmp.lt.u32.totalorder %s708_s30, %s857_s0 }
  0x1c   : > { %p470_p5 = pnand %p469_p3, %p468_p2  ;;  %p474_p7 = scmp.lt.u32.totalorder %s472_s16, %s467_s7 }
  0x1d   : > { %p476_p13 = scmp.lt.u32.totalorder %s467_s7, %s708_s30 }
  0x1e   : > { %p471_p6 = pneg %p470_p5  ;;  %p475_p10 = por %p474_p7, %p473_p4 }
  0x20   : > { %p477_p12 = por %p476_p13, %p475_p10 }
  0x22   : > { %p478_p1 = pnand %p477_p12, %p471_p6 }
  0x24   : > { %481 = shalt.err (!%p478_p1)
}
  0x25   : > { %s482_s20 = scalar_lea.vmem %s710_s4, 64  ;;  %s615_s26 = smov [#allocation2]  }
  0x26   : > { %p483_p2 = scmp.ne.s32.totalorder %s710_s4, %s482_s20  ;;  %s487_s27 = sshll.u32 %s615_s26, 4  ;;  %s488_s27 = int_to_ptr.vmem [resolvable:$false] %s487_s27 }
  0x27   : > { %s489_s28 = scalar_lea.vmem %s488_s27, 128  ;;  %p490_p9 = scmp.lt.s32.totalorder %s710_s4, %s488_s27 }
  0x28   : > { %p485_p5 = pnand %p483_p2, %p469_p3  ;;  %p491_p4 = scmp.lt.s32.totalorder %s489_s28, %s482_s20 }
  0x2a   : > { %p486_p11 = pneg %p485_p5  ;;  %p492_p7 = por %p491_p4, %p490_p9 }
  0x2c   : > { %p493_p10 = pnand %p492_p7, %p486_p11 }
  0x2e   : > { %496 = shalt.err (!%p493_p10)
}
  0x2f   : > { %s616_s29 = smov 32   ;;  %s617_s3 = smov 2  }
  0x30   : > { %400 = dma.hbm_to_vmem [thread:$0]  (!%p714_p0), %s708_s30, 64, %s710_s4, %s136_s6, %s616_s29, %s616_s29, %s617_s3  }
  0x31   : > { %p174_p12 = scmp.lt.s32.totalorder %s613_s14, 3  ;;  %s379_s7 = sshll.u32 %s701_s25, 1 }
  0x32   : > { %s380_s8 = sshll.u32 %s609_s13, 5  ;;  %p867_p9 = scmp.ge.s32.totalorder %s613_s14, 1 }
  0x33   : > { %s759_s19 = scalar_lea.hbm %s858_s1, %s380_s8  ;;  %s161_s20 = scalar_lea.vmem [#allocation5], %s379_s7 }
  0x34   : > { %p752_p11 = pnand %p867_p9, %p174_p12  ;;  %s169_s26 = sshll.u32 %s161_s20, 4  ;;  %s170_s26 = int_to_ptr.vmem [resolvable:$true] %s169_s26 }
  0x35   : > { %s158_s30 = scalar_lea.sflag [#allocation6], %s701_s25  ;;  %s497_s4 = scalar_lea.hbm %s759_s19, 32 }
  0x36   : > { %s868_s15 = scalar_select %p752_p11, 1, 0 }
  0x37   : > { %p498_p1 = scmp.ne.s32.totalorder %s759_s19, %s497_s4  ;;  %s502_s28 = scalar_lea.hbm %s858_s1, 64 }
  0x38   : > { %p503_p2 = scmp.lt.u32.totalorder %s759_s19, %s858_s1  ;;  %p504_p5 = scmp.lt.u32.totalorder %s502_s28, %s497_s4 }
  0x39   : > { %p500_p6 = pnand %p498_p1, %p469_p3  ;;  %p506_p7 = scmp.lt.u32.totalorder %s497_s4, %s759_s19 }
  0x3a   : > { %p505_p4 = por %p504_p5, %p503_p2 }
  0x3b   : > { %p501_p13 = pneg %p500_p6 }
  0x3c   : > { %p507_p10 = por %p506_p7, %p505_p4 }
  0x3e   : > { %p508_p12 = pnand %p507_p10, %p501_p13 }
  0x40   : > { %511 = shalt.err (!%p508_p12)
}
  0x41   : > { %s512_s25 = scalar_lea.vmem %s170_s26, 32  ;;  %s618_s7 = smov [#allocation5]  }
  0x42   : > { %p513_p9 = scmp.ne.s32.totalorder %s170_s26, %s512_s25  ;;  %s517_s8 = sshll.u32 %s618_s7, 4  ;;  %s518_s8 = int_to_ptr.vmem [resolvable:$false] %s517_s8 }
  0x43   : > { %s519_s16 = scalar_lea.vmem %s518_s8, 64  ;;  %p520_p8 = scmp.lt.s32.totalorder %s170_s26, %s518_s8 }
  0x44   : > { %p515_p1 = pnand %p513_p9, %p469_p3  ;;  %p521_p11 = scmp.lt.s32.totalorder %s519_s16, %s512_s25 }
  0x46   : > { %p516_p6 = pneg %p515_p1  ;;  %p522_p2 = por %p521_p11, %p520_p8 }
  0x48   : > { %p523_p5 = pnand %p522_p2, %p516_p6 }
  0x4a   : > { %526 = shalt.err (!%p523_p5)
}
  0x4b   : > { %403 = dma.hbm_to_vmem [thread:$0]  (!%p714_p0), %s759_s19, 32, %s170_s26, %s158_s30  }
  0x4c   : > { %p869_p13 = scmp.ne.s32.totalorder %s868_s15, 0 }
  0x4d   : > { %s784_s18 = sand.u32 (!%p869_p13), 1, %s597_s10   ;;  %p870_p3 = scmp.ne.s32.totalorder (!%p869_p13), %s863_s21, 0 }
  0x4e   : > { %178 = sbr.rel (%p869_p13) target bundleno = 154 (0x9a), region = 28  ;;  %s382_s20 = sshll.u32 (!%p869_p13), %s784_s18, 2 }
  0x4f   : > { %s181_s4 = scalar_lea.sflag (!%p869_p13), [#allocation3], %s784_s18  ;;  %s184_s6 = scalar_lea.vmem (!%p869_p13), [#allocation2], %s382_s20 }
  0x55   : > { %580 = dma.done.wait (%p870_p3), %s181_s4, 64  }
  0x56   : > { %582 = vsyncadd (%p870_p3), %s181_s4, 4294967232  ;;  %s383_s5 = sshll.u32 %s784_s18, 1  ;;  %s190_s15 = scalar_lea.sflag [#allocation6], %s784_s18 }
  0x57   : > { %s193_s19 = scalar_lea.vmem [#allocation5], %s383_s5 }
  0x58   : > { %584 = dma.done.wait (%p870_p3), %s190_s15, 32  }
  0x59   : > { %586 = vsyncadd (%p870_p3), %s190_s15, 4294967264  ;;  %v220_v0 = vld [vmem:[%s184_s6] sm:$0x3]  ;;  %v385_v1 = vld [vmem:[%s184_s6 + $0x2] sm:$0x3]  ;;  %v619_v21 = vmov 0.75  }
  0x5a   : > { %v223_v2 = vld [vmem:[%s193_s19] sm:$0x3]  ;;  %v225_v3 = vsub.f32 %v385_v1, %v220_v0  ;;  %s218_s21 = scalar_lea.vmem [#allocation7], %s383_s5  ;;  %s387_s30 = sshll.u32 %s605_s12, 5 }
  0x5b   : > { %vm224_vm0 = vcmp.eq.s32.totalorder %v223_v2, 0  ;;  %s267_s26 = sshll.u32 %s218_s21, 4  ;;  %s810_s29 = scalar_lea.hbm %s859_s2, %s387_s30  ;;  %s805_s26 = int_to_ptr.vmem [resolvable:$true] %s267_s26 }
  0x5c   : > { %v226_v4 = vsub.f32 0.0, %v225_v3  ;;  %v242_v22 = vsel %vm224_vm0, 0.25, %v619_v21  ;;  %s253_s3 = scalar_lea.sflag [#allocation4], %s784_s18  ;;  %s527_s25 = scalar_lea.vmem %s805_s26, 32 }
  0x5d   : > { %p528_p8 = scmp.ne.s32.totalorder %s805_s26, %s527_s25  ;;  %p871_p0 = scmp.ne.s32.totalorder %s864_s22, 0 }
  0x5e   : > { %v227_v5 = vsel %vm224_vm0, %v225_v3, %v226_v4  ;;  %s620_s12 = smov [#allocation7]  }
  0x5f   : > { %v228_v6 = vand.u32 2147483647, %v227_v5  ;;  %vm238_vm1 = vcmp.ge.f32.partialorder %v227_v5, 0.0  ;;  %v232_v11 = vmax.f32 %v227_v5, 0.0  ;;  %p529_p11 = pnand %p528_p8, %p871_p0  ;;  %s531_s7 = sshll.u32 %s620_s12, 4  ;;  %s532_s7 = int_to_ptr.vmem [resolvable:$false] %s531_s7 }
  0x60   : > { %s533_s8 = scalar_lea.vmem %s532_s7, 64  ;;  %p534_p7 = scmp.lt.s32.totalorder %s805_s26, %s532_s7 }
  0x61   : > { %v229_v7 = vsub.f32 0.0, %v228_v6  ;;  %p530_p4 = pneg %p529_p11  ;;  %p535_p10 = scmp.lt.s32.totalorder %s533_s8, %s527_s25 }
  0x63   : > { %v230_v8 = vmul.f32 1.442695, %v229_v7  ;;  %p536_p12 = por %p535_p10, %p534_p7 }
  0x65   : > { %461 = vpow2.f32 %v230_v8  ;;  %p537_p9 = pnand %p536_p12, %p530_p4 }
  0x6f   : > { %v462_v9 = vpop.eup %461 }
  0x70   : > { %v233_v10 = vadd.f32 1.0, %v462_v9  ;;  %v239_v12 = vsel %vm238_vm1, %v462_v9, 1.0 }
  0x72   : > { %463 = vlog2.f32 %v233_v10 }
  0x73   : > { %465 = vrcp.f32 %v233_v10 }
  0x7c   : > { %v464_v13 = vpop.eup %463 }
  0x7d   : > { %v466_v14 = vpop.eup %465  ;;  %v235_v15 = vmul.f32 0.6931472, %v464_v13 }
  0x7e   : > { %v241_v16 = vmul.f32 %v466_v14, %v239_v12 }
  0x7f   : > { %v236_v17 = vadd.f32 %v235_v15, %v232_v11 }
  0x80   : > { %v243_v18 = vsub.f32 1.0, %v241_v16 }
  0x81   : > { %v237_v19 = vsub.f32 0.0, %v236_v17 }
  0x82   : > { %v244_v20 = vmax.f32 %v243_v18, 0.0 }
  0x83   : > { %v248_v25 = vmul.f32 %v242_v22, %v237_v19 }
  0x84   : > { %v245_v23 = vmul.f32 %v244_v20, %v244_v20 }
  0x86   : > { %v246_v24 = vmul.f32 %v245_v23, %v245_v23 }
  0x88   : > { %v247_v26 = vsub.f32 0.0, %v246_v24 }
  0x8a   : > { %v249_v27 = vmul.f32 %v248_v25, %v247_v26 }
  0x8c   : > { %251 = vst [vmem:[%s218_s21] sm:$0x3] %v249_v27 }
  0x8d   : > { %540 = shalt.err (!%p537_p9)
}
  0x8e   : > { %s541_s16 = scalar_lea.hbm %s810_s29, 32  ;;  %s545_s4 = scalar_lea.hbm %s859_s2, 64 }
  0x8f   : > { %p542_p1 = scmp.ne.s32.totalorder %s810_s29, %s541_s16  ;;  %p546_p5 = scmp.lt.u32.totalorder %s810_s29, %s859_s2 }
  0x90   : > { %p547_p13 = scmp.lt.u32.totalorder %s545_s4, %s541_s16  ;;  %p549_p8 = scmp.lt.u32.totalorder %s541_s16, %s810_s29 }
  0x91   : > { %p543_p6 = pnand %p542_p1, %p871_p0 }
  0x92   : > { %p548_p3 = por %p547_p13, %p546_p5 }
  0x93   : > { %p544_p2 = pneg %p543_p6 }
  0x94   : > { %p550_p11 = por %p549_p8, %p548_p3 }
  0x96   : > { %p551_p4 = pnand %p550_p11, %p544_p2 }
  0x98   : > { %554 = shalt.err (!%p551_p4)
}
  0x99   : > { %395 = dma.vmem_to_hbm [thread:$0]  (%p871_p0), %s805_s26, 32, %s810_s29, %s253_s3  }
  0x9a PF: > { %s279_s15 = sand.u32 1, %s593_s9   ;;  %p872_p7 = scmp.ne.s32.totalorder %s865_s24, 0 }
  0x9b   : > { %p873_p10 = scmp.ge.s32.totalorder %s613_s14, 2  ;;  %s280_s19 = scalar_lea.sflag [#allocation4], %s279_s15 }
  0x9d   : > { %p405_p12 = pnand %p873_p10, %p872_p7 }
  0x9f   : > { %588 = dma.done.wait (!%p405_p12), %s280_s19, 32  }
  0xa0   : > { %590 = vsyncadd (!%p405_p12), %s280_s19, 4294967264  ;;  %s21_s14 = sadd.s32 1, %s613_s14   ;;  %s874_s9 = smov %s597_s10 }
  0xa1   : > { %p18_p9 = scmp.ge.s32.totalorder %s21_s14, 4   ;;  %s875_s10 = smov %s601_s11 }
  0xa2   : > { %s876_s11 = smov %s692_s23  ;;  %s877_s12 = smov %s609_s13 }
  0xa3   : > { %s878_s13 = smov %s880_s17  ;;  %20 = sbr.rel (!%p18_p9) target bundleno = 8 (0x8), region = 87 }
  0xaa   :  { %285 = vsyncpa [#allocation3], 1 }
  0xab   :  { %287 = vsyncpa [#allocation3 + $0x1], 1 }
  0xac   :  { %288 = vsyncpa [#allocation6], 1 }
  0xad   :  { %290 = vsyncpa [#allocation6 + $0x1], 1 }
  0xae   :  { %291 = vsyncpa [#allocation4], 1 }
  0xaf   :  { %293 = vsyncpa [#allocation4 + $0x1], 1 }

</bundles_post_ra>
